<compile_context>
chip_gen: v5e
topology: v5e:2x2
jax: 0.10.0
libtpu: 0.0.40
codegen_flags: <defaults>
</compile_context>

<pallas_src>
import functools
import math

import jax
import jax.numpy as jnp
import numpy as np
from jax.experimental import pallas as pl
from jax.experimental.pallas import tpu as pltpu


def _round_up(x, m):
    return ((x + m - 1) // m) * m


def _num_tensorcores_per_chip():
    # v7x has 2 TensorCores per chip ("parallel" grid axes are sharded across
    # them); v5e/v6e have 1 and the grid is just a serial loop.
    try:
        kind = jax.devices()[0].device_kind.lower()
    except Exception:
        return 1
    return 2 if ("v7" in kind or "7x" in kind) else 1


def _choose_spatial_tile(hw, batch, n_cores, k_stack):
    """Lane-dense (multiple-of-128) tile along the per-image H*W axis.

    Single-TC chips (v5e/v6e): grid steps are a serial loop (~0.35 us each)
    and every step re-reads a fixed 128-lane halo, so take the biggest tile
    the stacked-K operand budget allows.  v7x: additionally keep
    batch*num_tiles even so neither TensorCore idles on a trailing tile.
    """
    # Cap TN so the in-kernel stacked (kh*kw*Cin, TN) f32 operand stays small.
    max_tn = max(128, min(2048, ((4 << 20) // (4 * k_stack)) // 128 * 128))
    hw128 = _round_up(hw, 128)
    ntiles = max(1, -(-hw128 // max_tn))
    if n_cores > 1 and (batch * ntiles) % n_cores != 0 and hw128 > 128:
        ntiles += 1                       # even split across the 2 TCs
    tn = _round_up(-(-hw128 // ntiles), 128)
    ntiles = -(-hw128 // tn)
    return tn, tn * ntiles


# ---------------------------------------------------------------------------
# Pallas kernel: one output tile = ONE MXU matmul with K = Cin*kh*kw.
#   x_ref   : (Cin, HW_in_pad)        per-image flat input, resident across
#                                     all spatial tiles of this image
#   w_ref   : (Cout_pad, kh*kw*Cin)   tap-major stacked filter bank, resident
#   out_ref : (Cout_pad, TN)          lane-dense output tile for this step
# ---------------------------------------------------------------------------
def _gabor_conv_kernel(x_ref, w_ref, out_ref, *, shifts, tn, halo):
    n0 = pl.multiple_of(pl.program_id(1) * tn, 128)
    # One 128-aligned dynamic load of (tile + halo); the kh*kw shifted views
    # are static slices of it, stacked along K (tap-major: K = tap*Cin + c)
    # to match the weight layout, then a single K-folded MXU matmul.
    xwin = x_ref[:, pl.ds(n0, tn + halo)]                    # (Cin, TN + halo)
    x_stack = jnp.concatenate([xwin[:, s:s + tn] for s in shifts], axis=0)
    out_ref[...] = jnp.dot(
        w_ref[...], x_stack, preferred_element_type=jnp.float32
    ).astype(out_ref.dtype)


def gabor_conv2d(x, weight, *, mxu_dtype=jnp.float32, out_dtype=jnp.float32):
    """VALID conv (stride=1, padding=0, dilation=1, groups=1, bias=False).

    x: (B, Cin, H, W) NCHW, weight: (Cout, Cin, kh, kw) OIHW ->
    out: (B, Cout, Ho, Wo) NCHW.

    mxu_dtype: MXU operand dtype (accumulation is always f32).  bf16 halves
    input DMA / resident VMEM and hits the bf16 MXU peak (worth it on
    bandwidth-bound v5e) but misses the 1e-4 f32 reference tolerance, so the
    default stays f32.  out_dtype=bf16 additionally halves output writeback
    if the consumer tolerates it.
    """
    B, Cin, H, W = x.shape
    Cout, _, kh, kw = weight.shape
    Ho, Wo = H - kh + 1, W - kw + 1
    HW = H * W
    khw = kh * kw
    k_stack = khw * Cin
    cout_pad = _round_up(Cout, 8)

    n_cores = _num_tensorcores_per_chip()
    tn, hw_pad = _choose_spatial_tile(HW, B, n_cores, k_stack)
    max_shift = (kh - 1) * W + (kw - 1)
    halo = _round_up(max_shift, 128)      # lane-aligned halo for the window
    hw_in_pad = hw_pad + halo

    # (B, Cin, H, W) -> (B, Cin, H*W) is a pure reshape (no HBM relayout);
    # only the halo / lane tail is zero-padded.  Out-of-window and padded
    # positions are sliced off after the kernel, so their values never matter.
    x_flat = x.reshape(B, Cin, HW)
    x_flat = jnp.pad(x_flat, ((0, 0), (0, 0), (0, hw_in_pad - HW)))
    x_flat = x_flat.astype(mxu_dtype)

    # OIHW -> (Cout_pad, kh*kw*Cin), tap-major K (K index = (dh*kw+dw)*Cin+c),
    # matching the in-kernel concatenate order -> one K-folded matmul.
    w2d = jnp.transpose(weight, (0, 2, 3, 1)).reshape(Cout, k_stack)
    if cout_pad != Cout:
        w2d = jnp.pad(w2d, ((0, cout_pad - Cout), (0, 0)))
    w2d = w2d.astype(mxu_dtype)

    shifts = tuple(dh * W + dw for dh in range(kh) for dw in range(kw))
    kernel = functools.partial(_gabor_conv_kernel, shifts=shifts, tn=tn,
                               halo=halo)

    elem = jnp.dtype(mxu_dtype).itemsize
    out_elem = jnp.dtype(out_dtype).itemsize
    # Explicit VMEM budget: per-image resident x slab + resident weights
    # (both double-buffered by the default pipeline), double-buffered output
    # tile, the in-kernel stacked-K operand, plus headroom.
    vmem_need = (2 * Cin * hw_in_pad * elem
                 + 2 * cout_pad * k_stack * elem
                 + 2 * cout_pad * tn * out_elem
                 + k_stack * tn * 4
                 + (2 << 20))
    try:
        vmem_cap = int(pltpu.get_tpu_info().vmem_capacity_bytes)
    except Exception:
        vmem_cap = 64 << 20
    vmem_limit = int(min(max(vmem_need, 16 << 20), int(vmem_cap * 0.45)))
    # TODO(synk): if the per-image slab (Cin * hw_in_pad) itself exceeds this
    # budget (very large images on v7x's 64 MiB/TC VMEM), switch to a manual
    # double-buffered halo-window pipeline (x in memory_space=pl.ANY +
    # pltpu.make_async_copy of (Cin, TN+halo) windows); unreachable at the
    # shapes this module is used with.

    grid = (B, hw_pad // tn)
    out_flat = pl.pallas_call(
        kernel,
        out_shape=jax.ShapeDtypeStruct((B, cout_pad, hw_pad), out_dtype),
        grid=grid,
        in_specs=[
            # Per-image flat input: fetched once per batch index, stays
            # resident in VMEM across all spatial tiles of that image.
            pl.BlockSpec((None, Cin, hw_in_pad), lambda b, n: (b, 0, 0)),
            # Stacked filter bank: grid-invariant, fetched once.
            pl.BlockSpec((cout_pad, k_stack), lambda b, n: (0, 0)),
        ],
        out_specs=pl.BlockSpec((None, cout_pad, tn), lambda b, n: (b, 0, n)),
        compiler_params=pltpu.CompilerParams(
            dimension_semantics=("parallel", "parallel"),
            vmem_limit_bytes=vmem_limit),
        cost_estimate=pl.CostEstimate(
            flops=2 * B * cout_pad * k_stack * hw_pad,
            transcendentals=0,
            bytes_accessed=(elem * (B * Cin * hw_in_pad + cout_pad * k_stack)
                            + out_elem * B * cout_pad * hw_pad)),
    )(x_flat, w2d)

    # Drop Cout / spatial padding and keep the VALID region.  No transpose:
    # the kernel already produced NCHW-ordered data.
    out = out_flat[:, :Cout, :HW].reshape(B, Cout, H, W)
    return out[:, :, :Ho, :Wo]


# ---------------------------------------------------------------------------
# Gabor filter-bank generation (plain JAX; tiny, launch-dominated as a kernel).
# ---------------------------------------------------------------------------
def compute_gabor_weights(freq, theta, sigma, psi, x_grid, y_grid):
    delta = 0.001
    f = freq[:, :, None, None]
    t = theta[:, :, None, None]
    s = sigma[:, :, None, None]
    p = psi[:, :, None, None]
    xg = x_grid[None, None, :, :]
    yg = y_grid[None, None, :, :]
    cos_t, sin_t = jnp.cos(t), jnp.sin(t)
    rotx = xg * cos_t + yg * sin_t
    roty = -xg * sin_t + yg * cos_t
    g = jnp.exp(-0.5 * ((rotx ** 2 + roty ** 2) / (s + delta) ** 2))
    g = g * jnp.cos(f * rotx + p)
    g = g / (2.0 * math.pi * s ** 2)
    return g  # (O, I, kh, kw)


# ---------------------------------------------------------------------------
# Parameter init (deterministic, mirrors GaborConv2d.__init__).
# ---------------------------------------------------------------------------
def init_gabor_params(key, in_channels, out_channels, kernel_size):
    O, I = out_channels, in_channels
    kh = kw = kernel_size
    k_freq, k_theta, k_psi = jax.random.split(key, 3)

    freq = (math.pi / 2.0) * (
        jnp.float32(math.sqrt(2.0))
        ** (-jax.random.randint(k_freq, (O, I), 0, 5).astype(jnp.float32))
    )
    theta = (math.pi / 8.0) * jax.random.randint(
        k_theta, (O, I), 0, 8
    ).astype(jnp.float32)
    sigma = math.pi / freq
    psi = math.pi * jax.random.uniform(k_psi, (O, I), dtype=jnp.float32)

    x0 = math.ceil(kh / 2)
    y0 = math.ceil(kw / 2)
    # torch.meshgrid(ij): y varies along rows (kernel_size[0]), x along cols.
    lin_a = jnp.linspace(-x0 + 1.0, float(x0), kh).astype(jnp.float32)
    lin_b = jnp.linspace(-y0 + 1.0, float(y0), kw).astype(jnp.float32)
    y_grid = jnp.broadcast_to(lin_a[:, None], (kh, kw)).astype(jnp.float32)
    x_grid = jnp.broadcast_to(lin_b[None, :], (kh, kw)).astype(jnp.float32)

    return freq, theta, sigma, psi, x_grid, y_grid


def gabor_conv2d_forward(x, params):
    # Mirrors GaborConv2d.forward: weights recomputed from the Gabor params,
    # then the plain Conv2d is applied.
    # TODO(synk): the training/eval `is_calculated` caching flag is stateful;
    # stateless JAX recomputes the (identical, tiny) filter bank each call.
    freq, theta, sigma, psi, x_grid, y_grid = params
    weight = compute_gabor_weights(freq, theta, sigma, psi, x_grid, y_grid)
    return gabor_conv2d(x, weight)


# ---------------------------------------------------------------------------
# Pure-JAX reference (for correctness check only).
# ---------------------------------------------------------------------------
def reference_forward(x, params):
    freq, theta, sigma, psi, x_grid, y_grid = params
    g = compute_gabor_weights(freq, theta, sigma, psi, x_grid, y_grid)
    return jax.lax.conv_general_dilated(
        x, g, window_strides=(1, 1), padding="VALID",
        dimension_numbers=("NCHW", "OIHW", "NCHW"),
    )


if __name__ == "__main__":
    B, Cin, Cout, H, W, ksize = 2, 4, 8, 16, 16, 3

    key = jax.random.PRNGKey(0)
    k_params, k_x = jax.random.split(key)
    params = init_gabor_params(k_params, Cin, Cout, ksize)
    x = jax.random.normal(k_x, (B, Cin, H, W), dtype=jnp.float32)

    fwd = jax.jit(gabor_conv2d_forward)
    out = jax.block_until_ready(fwd(x, params))

    assert out.shape == (B, Cout, H - ksize + 1, W - ksize + 1)
    ref = jax.block_until_ready(reference_forward(x, params))
    err = float(np.max(np.abs(np.asarray(out) - np.asarray(ref))))
    assert np.allclose(np.asarray(out), np.asarray(ref),
                       rtol=1e-4, atol=1e-4), f"max abs err = {err}"

    print("KERNEL_OK")
</pallas_src>

<mosaic_0001>
module attributes {stable_mosaic.version = 11 : i64} {
  func.func @_gabor_conv_kernel(%arg0: i32, %arg1: i32, %arg2: memref<1x4x384xf32, #tpu.memory_space<vmem>>, %arg3: memref<8x36xf32, #tpu.memory_space<vmem>>, %arg4: memref<1x8x256xf32, #tpu.memory_space<vmem>>) attributes {dimension_semantics = [#tpu.dimension_semantics<parallel>, #tpu.dimension_semantics<parallel>], iteration_bounds = array<i64: 2, 1>, scalar_prefetch = 0 : i64, scratch_operands = 0 : i64, tpu.core_type = #tpu.core_type<tc>, window_params = [{transform_indices = @transform_0, window_bounds = array<i64: 1, 4, 384>}, {pipeline_mode = #tpu.pipeline_mode<synchronous>, transform_indices = @transform_1, window_bounds = array<i64: 8, 36>}, {transform_indices = @transform_2, window_bounds = array<i64: 1, 8, 256>}]} {
    %c256_i32 = arith.constant 256 : i32
    %0 = arith.muli %arg1, %c256_i32 : i32
    %1 = tpu.assume_multiple %0, 128 : i32
    %c0 = arith.constant 0 : index
    %c0_0 = arith.constant 0 : index
    %2 = arith.index_cast %1 : i32 to index
    %3 = vector.load %arg2[%c0, %c0_0, %2] : memref<1x4x384xf32, #tpu.memory_space<vmem>>, vector<1x4x384xf32>
    %4 = vector.shape_cast %3 : vector<1x4x384xf32> to vector<4x384xf32>
    %5 = vector.extract_strided_slice %4 {offsets = [0, 0], sizes = [4, 256], strides = [1, 1]} : vector<4x384xf32> to vector<4x256xf32>
    %6 = vector.extract_strided_slice %4 {offsets = [0, 1], sizes = [4, 256], strides = [1, 1]} : vector<4x384xf32> to vector<4x256xf32>
    %7 = vector.extract_strided_slice %4 {offsets = [0, 2], sizes = [4, 256], strides = [1, 1]} : vector<4x384xf32> to vector<4x256xf32>
    %8 = vector.extract_strided_slice %4 {offsets = [0, 16], sizes = [4, 256], strides = [1, 1]} : vector<4x384xf32> to vector<4x256xf32>
    %9 = vector.extract_strided_slice %4 {offsets = [0, 17], sizes = [4, 256], strides = [1, 1]} : vector<4x384xf32> to vector<4x256xf32>
    %10 = vector.extract_strided_slice %4 {offsets = [0, 18], sizes = [4, 256], strides = [1, 1]} : vector<4x384xf32> to vector<4x256xf32>
    %11 = vector.extract_strided_slice %4 {offsets = [0, 32], sizes = [4, 256], strides = [1, 1]} : vector<4x384xf32> to vector<4x256xf32>
    %12 = vector.extract_strided_slice %4 {offsets = [0, 33], sizes = [4, 256], strides = [1, 1]} : vector<4x384xf32> to vector<4x256xf32>
    %13 = vector.extract_strided_slice %4 {offsets = [0, 34], sizes = [4, 256], strides = [1, 1]} : vector<4x384xf32> to vector<4x256xf32>
    %14 = tpu.concatenate %5, %6, %7, %8, %9, %10, %11, %12, %13 in 0 : vector<4x256xf32>, vector<4x256xf32>, vector<4x256xf32>, vector<4x256xf32>, vector<4x256xf32>, vector<4x256xf32>, vector<4x256xf32>, vector<4x256xf32>, vector<4x256xf32> -> vector<36x256xf32>
    %c0_1 = arith.constant 0 : index
    %c0_2 = arith.constant 0 : index
    %15 = vector.load %arg3[%c0_1, %c0_2] : memref<8x36xf32, #tpu.memory_space<vmem>>, vector<8x36xf32>
    %cst = arith.constant dense<0.000000e+00> : vector<8x256xf32>
    %16 = tpu.matmul %15, %14, %cst {dimension_numbers = #tpu.dot_dimension_numbers<[1], [0], [0], [1], [0, 0, 1, 1], [], []>} : vector<8x36xf32>, vector<36x256xf32>, vector<8x256xf32> -> vector<8x256xf32>
    %c0_3 = arith.constant 0 : index
    %c0_4 = arith.constant 0 : index
    %c0_5 = arith.constant 0 : index
    %17 = vector.load %arg4[%c0_3, %c0_4, %c0_5] : memref<1x8x256xf32, #tpu.memory_space<vmem>>, vector<1x8x256xf32>
    %18 = vector.shape_cast %17 : vector<1x8x256xf32> to vector<8x256xf32>
    %19 = vector.shape_cast %16 : vector<8x256xf32> to vector<1x8x256xf32>
    tpu.vector_store %arg4[%c0_3, %c0_4, %c0_5], %19 {strides = array<i32>} : memref<1x8x256xf32, #tpu.memory_space<vmem>>, vector<1x8x256xf32>,
    return
  }
  func.func @transform_0(%arg0: i32, %arg1: i32) -> (i32, i32, i32) {
    %c0_i32 = arith.constant 0 : i32
    %c0_i32_0 = arith.constant 0 : i32
    %c0_i32_1 = arith.constant 0 : i32
    return %arg0, %c0_i32, %c0_i32_0 : i32, i32, i32
  }
  func.func @transform_1(%arg0: i32, %arg1: i32) -> (i32, i32) {
    %c0_i32 = arith.constant 0 : i32
    %c0_i32_0 = arith.constant 0 : i32
    %c0_i32_1 = arith.constant 0 : i32
    return %c0_i32, %c0_i32_0 : i32, i32
  }
  func.func @transform_2(%arg0: i32, %arg1: i32) -> (i32, i32, i32) {
    %c0_i32 = arith.constant 0 : i32
    %c0_i32_0 = arith.constant 0 : i32
    return %arg0, %c0_i32, %arg1 : i32, i32, i32
  }
}

</mosaic_0001>

<bundles_post_ra>
// kernel: neg.0
= control target key start
LH: loop header
LB: loop body
LE: loop exit
PB: predicated region body
PF: predicated region fallthrough
CT: control target
= control target key end

     0   :  { %s24_s0 = inlined_call_operand.vmem [shape: f32[3,3], index: 0, kind: input, shape index: {}]   ;;  %s25_s1 = inlined_call_operand.vmem [shape: f32[3,3], index: 1, kind: output, shape index: {}]  }
   0x1   :  { %v2_v0 = vld [vmem:[%s24_s0] sm:$0x7] }
   0x2   :  { %v5_v1 = vxor.u32 2147483648, %v2_v0 }
   0x4   :  { %7 = vst [vmem:[%s25_s1] sm:$0xf] %v5_v1 }

// kernel: gabor_conv2d_forward.1
= control target key start
LH: loop header
LB: loop body
LE: loop exit
PB: predicated region body
PF: predicated region fallthrough
CT: control target
= control target key end

     0   :  { %s592_s9 = smov 0   ;;  %s594_s10 = smov 0   ;;  %s676_s0 = inlined_call_operand.vmem [shape: f32[2,4,384], index: 0, kind: input, shape index: {}]   ;;  %s677_s1 = inlined_call_operand.vmem [shape: f32[8,36], index: 1, kind: input, shape index: {}]   ;;  %s678_s2 = inlined_call_operand.vmem [shape: f32[2,8,256], index: 2, kind: output, shape index: {}]  }
   0x1   :  { %s596_s11 = smov 0  }
   0x2 LB: > { %s24_s12 = sadd.s32 1, %s563_s10  ;;  %p466_p0 = scmp.ge.s32.totalorder %s567_s11, 1  ;;  %s567_s11 = sphi %s596_s11, %s12_s11   ;;  %s563_s10 = sphi %s594_s10, %s680_s10   ;;  %s559_s9 = sphi %s592_s9, %s679_s9  }
   0x3   : > { %p26_p1 = scmp.ge.s32.totalorder %s24_s12, 2  ;;  %p126_p2 = scmp.lt.s32.totalorder %s567_s11, 3 }
   0x5   : > { %s682_s12 = smov (%p26_p1, %s24_s12), 0  ;;  %p127_p3 = pnand %p466_p0, %p126_p2 }
   0x6   : > { %p152_p4 = scmp.lt.s32.totalorder (!%p127_p3), %s559_s9, 1  ;;  %s569_s17 = smov (!%p127_p3), 126  }
   0x7   : > { %130 = sbr.rel (%p127_p3) target bundleno = 353 (0x161), region = 28  ;;  %s570_s18 = smov (!%p127_p3), 112  }
   0x8   : > { %s571_s19 = smov (!%p127_p3), 111   ;;  %s572_s20 = smov (!%p127_p3), 96  }
   0x9   : > { %s573_s21 = smov (!%p127_p3), 110   ;;  %s574_s22 = smov (!%p127_p3), 95  }
   0xa   : > { %s575_s23 = smov (!%p127_p3), 94   ;;  %s576_s24 = smov (!%p127_p3), 127  }
   0xc   : > { %s684_s9 = smov (!%p152_p4, %s559_s9), 1  ;;  %vm299_vm0 = vcmask 777216   ;;  %vm281_vm1 = vcmask 785408   ;;  %vm316_vm2 = vcmask 769024   ;;  %vm246_vm3 = vcmask 908288  }
   0xd   : > { %s477_s13 = smul.u32 12, %s684_s9  ;;  %vm229_vm4 = vcmask 916480   ;;  %vm264_vm5 = vcmask 900096   ;;  %vm319_vm6 = vcmask 1043456   ;;  %vm211_vm7 = vcmask 1031168   ;;  %s476_s27 = sshll.u32 %s684_s9, 4 }
   0xe   : > { %vm194_vm8 = vcmask 1039360   ;;  %vm329_vm9 = vcmask 293888   ;;  %s165_s30 = scalar_lea.vmem %s678_s2, %s476_s27 }
   0xf   : > { %s156_s16 = scalar_lea.vmem %s676_s0, %s477_s13 }
  0x10   : > { %v616_v0 = vld [vmem:[%s156_s16] sm:$0xff]  ;;  %v173_v1 = vld [vmem:[%s156_s16 + $0x8] sm:$0xf] }
  0x11   : > { %175 = vst [vmem:[#allocation1] ss:$2 sm:$0xff] %v616_v0 }
  0x12   : > { %184 = vst [vmem:[#allocation1 + $0x11] ss:$2 sm:$0xff] %v173_v1 }
  0x18   : > { %v619_v2 = vld.sshfl [vmem:[#allocation1] sm:$0xff pattern:$0x75316420]  ;;  %v621_v3 = vld.sshfl [vmem:[#allocation1 + $0x8] sm:$0xff pattern:$0x75316420] }
  0x19   : > { %182 = vst [vmem:[#allocation1 + $0x1] ss:$2 sm:$0xff] %v616_v0  ;;  %v624_v4 = vld.sshfl [vmem:[#allocation1 + $0x10] sm:$0xff pattern:$0x75316420] }
  0x1a   : > { %201 = vst [vmem:[#allocation1 + $0x10] ss:$2 sm:$0xff] %v173_v1 }
  0x20   : > { %v626_v5 = vld.sshfl [vmem:[#allocation1] sm:$0xff pattern:$0x75316420]  ;;  %v628_v6 = vld.sshfl [vmem:[#allocation1 + $0x8] sm:$0xff pattern:$0x75316420] }
  0x21   : > { %199 = vst [vmem:[#allocation1] ss:$2 sm:$0xff] %v616_v0  ;;  %v204_v7 = vld.sshfl [vmem:[#allocation1 + $0x10] sm:$0xff pattern:$0x75316420]  ;;  %v540_v24 = vpack.i.bf16 %v628_v6, %v626_v5 }
  0x22   : > { %209 = vrot.lane.b32.xlu0 %v204_v7, %s569_s17  ;;  %219 = vst [vmem:[#allocation1 + $0x11] ss:$2 sm:$0xff] %v173_v1 }
  0x28   : > { %v202_v8 = vld.sshfl [vmem:[#allocation1] sm:$0xff pattern:$0x75316420]  ;;  %v203_v9 = vld.sshfl [vmem:[#allocation1 + $0x8] sm:$0xff pattern:$0x75316420] }
  0x29   : > { %217 = vst [vmem:[#allocation1 + $0x1] ss:$2 sm:$0xff] %v616_v0  ;;  %v510_v10 = vpack.i.bf16 %v203_v9, %v202_v8  ;;  %v222_v11 = vld.sshfl [vmem:[#allocation1 + $0x10] sm:$0xff pattern:$0x75316420] }
  0x2a   : > { %236 = vst [vmem:[#allocation1 + $0x10] ss:$2 sm:$0xff] %v173_v1 }
  0x2b   : > { %511 = vrot.lane.b32.xlu2 %v510_v10, %s569_s17 }
  0x30   : > { %v220_v12 = vld.sshfl [vmem:[#allocation1] sm:$0xff pattern:$0x75316420]  ;;  %v221_v13 = vld.sshfl [vmem:[#allocation1 + $0x8] sm:$0xff pattern:$0x75316420] }
  0x31   : > { %v515_v14 = vpack.i.bf16 %v221_v13, %v220_v12  ;;  %234 = vst [vmem:[#allocation1] ss:$2 sm:$0xff] %v616_v0  ;;  %v239_v15 = vld.sshfl [vmem:[#allocation1 + $0x10] sm:$0xff pattern:$0x75316420] }
  0x32   : > { %254 = vst [vmem:[#allocation1 + $0x11] ss:$2 sm:$0xff] %v173_v1 }
  0x33   : > { %516 = vrot.lane.b32.xlu1 %v515_v14, %s570_s18  ;;  %244 = vrot.lane.b32.xlu2 %v239_v15, %s571_s19 }
  0x38   : > { %v237_v16 = vld.sshfl [vmem:[#allocation1] sm:$0xff pattern:$0x75316420]  ;;  %v238_v17 = vld.sshfl [vmem:[#allocation1 + $0x8] sm:$0xff pattern:$0x75316420] }
  0x39   : > { %v520_v18 = vpack.i.bf16 %v238_v17, %v237_v16  ;;  %252 = vst [vmem:[#allocation1 + $0x1] ss:$2 sm:$0xff] %v616_v0  ;;  %v257_v19 = vld.sshfl [vmem:[#allocation1 + $0x10] sm:$0xff pattern:$0x75316420] }
  0x3a   : > { %271 = vst [vmem:[#allocation1 + $0x10] ss:$2 sm:$0xff] %v173_v1 }
  0x3b   : > { %521 = vrot.lane.b32.xlu1 %v520_v18, %s571_s19 }
  0x40   : > { %v255_v20 = vld.sshfl [vmem:[#allocation1] sm:$0xff pattern:$0x75316420]  ;;  %v256_v21 = vld.sshfl [vmem:[#allocation1 + $0x8] sm:$0xff pattern:$0x75316420] }
  0x41   : > { %v525_v22 = vpack.i.bf16 %v256_v21, %v255_v20  ;;  %269 = vst [vmem:[#allocation1] ss:$2 sm:$0xff] %v616_v0  ;;  %v274_v23 = vld.sshfl [vmem:[#allocation1 + $0x10] sm:$0xff pattern:$0x75316420] }
  0x42   : > { %289 = vst [vmem:[#allocation1 + $0x11] ss:$2 sm:$0xff] %v173_v1  ;;  %279 = vrot.lane.b32.xlu2 %v274_v23, %s572_s20 }
  0x43   : > { %262 = vrot.lane.b32.xlu1 %v257_v19, %s573_s21  ;;  %526 = vrot.lane.b32.xlu0 %v525_v22, %s573_s21 }
  0x48   : > { %v272_v25 = vld.sshfl [vmem:[#allocation1] sm:$0xff pattern:$0x75316420]  ;;  %v273_v26 = vld.sshfl [vmem:[#allocation1 + $0x8] sm:$0xff pattern:$0x75316420] }
  0x49   : > { %v530_v27 = vpack.i.bf16 %v273_v26, %v272_v25  ;;  %287 = vst [vmem:[#allocation1 + $0x1] ss:$2 sm:$0xff] %v616_v0  ;;  %v292_v28 = vld.sshfl [vmem:[#allocation1 + $0x10] sm:$0xff pattern:$0x75316420]  ;;  %v328_v26 = vld [vmem:[%s677_s1] sm:$0xff] }
  0x4a   : > { %306 = vst [vmem:[#allocation1 + $0x10] ss:$2 sm:$0xff] %v173_v1 }
  0x4b   : > { %531 = vrot.lane.b32.xlu1 %v530_v27, %s572_s20  ;;  %297 = vrot.lane.b32.xlu0 %v292_v28, %s574_s22 }
  0x50   : > { %v290_v29 = vld.sshfl [vmem:[#allocation1] sm:$0xff pattern:$0x75316420]  ;;  %v291_v30 = vld.sshfl [vmem:[#allocation1 + $0x8] sm:$0xff pattern:$0x75316420] }
  0x51   : > { %v535_v31 = vpack.i.bf16 %v291_v30, %v290_v29  ;;  %304 = vst [vmem:[#allocation1] ss:$2 sm:$0xff] %v616_v0  ;;  %v309_v32 = vld.sshfl [vmem:[#allocation1 + $0x10] sm:$0xff pattern:$0x75316420] }
  0x53   : > { %536 = vrot.lane.b32.xlu2 %v535_v31, %s574_s22  ;;  %314 = vrot.lane.b32.xlu1 %v309_v32, %s575_s23 }
  0x58   : > { %v307_v33 = vld.sshfl [vmem:[#allocation1] sm:$0xff pattern:$0x75316420]  ;;  %v308_v34 = vld.sshfl [vmem:[#allocation1 + $0x8] sm:$0xff pattern:$0x75316420] }
  0x59   : > { %310 = vrot.lane.b32.xlu0 %v307_v33, %s575_s23 }
  0x5b   : > { %227 = vrot.lane.b32.xlu2 %v222_v11, %s570_s18  ;;  %192 = vrot.lane.b32.xlu1 %v624_v4, %s576_s24 }
  0x61   : > { %312 = vrot.lane.b32.xlu0 %v308_v34, %s575_s23 }
  0x69   : > { %541 = vrot.lane.b32.xlu0 %v540_v24, %s576_s24 }
  0x85   : > { %v512_v36 = vpop.permute.xlu2 %511 }
  0x86   : > { %v513_v47 = vunpack.i.l.bf16 %v512_v36  ;;  %v514_v6 = vunpack.i.h.bf16 %v512_v36 }
  0x88   : > { %v212_v13 = vsel %vm211_vm7, %v513_v47, %v514_v6 }
  0x8d   : > { %v245_v39 = vpop.permute.xlu2 %244 }
  0x94   : > { %v210_v37 = vpop.permute.xlu0 %209 }
  0x95   : > { %v213_v17 = vsel %vm211_vm7, %v514_v6, %v210_v37 }
  0x9c   : > { %v280_v42 = vpop.permute.xlu2 %279 }
  0xa5   : > { %v517_v35 = vpop.permute.xlu1 %516 }
  0xa6   : > { %v519_v57 = vunpack.i.h.bf16 %v517_v35  ;;  %v518_v58 = vunpack.i.l.bf16 %v517_v35 }
  0xa8   : > { %v230_v14 = vsel %vm229_vm4, %v518_v58, %v519_v57 }
  0xa9   : > { %v322_v18 = vsel %vm319_vm6, %v212_v13, %v230_v14 }
  0xad   : > { %v522_v38 = vpop.permute.xlu1 %521  ;;  %v537_v45 = vpop.permute.xlu2 %536 }
  0xae   : > { %v539_v48 = vunpack.i.h.bf16 %v537_v45  ;;  %v538_v49 = vunpack.i.l.bf16 %v537_v45  ;;  %v524_v52 = vunpack.i.h.bf16 %v522_v38  ;;  %v523_v53 = vunpack.i.l.bf16 %v522_v38 }
  0xb0   : > { %v300_v62 = vsel %vm299_vm0, %v538_v49, %v539_v48  ;;  %v247_v5 = vsel %vm246_vm3, %v523_v53, %v524_v52  ;;  %v248_v8 = vsel %vm246_vm3, %v524_v52, %v245_v39 }
  0xb5   : > { %v527_v40 = vpop.permute.xlu0 %526  ;;  %v263_v41 = vpop.permute.xlu1 %262 }
  0xb6   : > { %v529_v54 = vunpack.i.h.bf16 %v527_v40  ;;  %v528_v55 = vunpack.i.l.bf16 %v527_v40  ;;  %v228_v0 = vpop.permute.xlu2 %227 }
  0xb7   : > { %v231_v12 = vsel %vm229_vm4, %v519_v57, %v228_v0 }
  0xb8   : > { %v265_v7 = vsel %vm264_vm5, %v528_v55, %v529_v54  ;;  %v266_v9 = vsel %vm264_vm5, %v529_v54, %v263_v41  ;;  %v323_v19 = vsel %vm319_vm6, %v213_v17, %v231_v12 }
  0xb9   : > { %v324_v15 = vsel %vm319_vm6, %v247_v5, %v265_v7  ;;  %v325_v16 = vsel %vm319_vm6, %v248_v8, %v266_v9 }
  0xbd   : > { %v298_v43 = vpop.permute.xlu0 %297  ;;  %v532_v44 = vpop.permute.xlu1 %531 }
  0xbe   : > { %v534_v50 = vunpack.i.h.bf16 %v532_v44  ;;  %v533_v51 = vunpack.i.l.bf16 %v532_v44  ;;  %v301_v59 = vsel %vm299_vm0, %v539_v48, %v298_v43 }
  0xc0   : > { %v282_v61 = vsel %vm281_vm1, %v533_v51, %v534_v50  ;;  %v283_v63 = vsel %vm281_vm1, %v534_v50, %v280_v42 }
  0xc1   : > { %v326_v10 = vsel %vm319_vm6, %v282_v61, %v300_v62  ;;  %v327_v11 = vsel %vm319_vm6, %v283_v63, %v301_v59 }
  0xc5   : > { %v315_v56 = vpop.permute.xlu1 %314 }
  0xcb   : > { %v311_v46 = vpop.permute.xlu0 %310 }
  0xcd   : > { %v193_v21 = vpop.permute.xlu1 %192 }
  0xd3   : > { %v313_v60 = vpop.permute.xlu0 %312 }
  0xd4   : > { %v317_v1 = vsel %vm316_vm2, %v311_v46, %v313_v60  ;;  %v318_v4 = vsel %vm316_vm2, %v313_v60, %v315_v56 }
  0xd5   : > { %470 = vmatpush.msk.msra.mxu0 %vm319_vm6, %v317_v1  ;;  %472 = vmatpush.msk.msra.mxu1 %vm319_vm6, %v318_v4 }
  0xd7   : > { %349 = vmatpush.msra.mxu0 %v326_v10  ;;  %369 = vmatpush.msra.mxu1 %v327_v11 }
  0xd9   : > { %350 = vmatpush.msra.mxu0 %v324_v15  ;;  %370 = vmatpush.msra.mxu1 %v325_v16 }
  0xdb   : > { %351 = vmatpush.msra.mxu0 %v322_v18  ;;  %371 = vmatpush.msra.mxu1 %v323_v19  ;;  %v542_v20 = vpop.permute.xlu0 %541 }
  0xdc   : > { %v544_v22 = vunpack.i.h.bf16 %v542_v20  ;;  %v543_v23 = vunpack.i.l.bf16 %v542_v20 }
  0xde   : > { %v196_v24 = vsel %vm194_vm8, %v544_v22, %v193_v21  ;;  %v195_v25 = vsel %vm194_vm8, %v543_v23, %v544_v22 }
  0xdf   : > { %v320_v27 = vsel %vm319_vm6, %v619_v2, %v195_v25  ;;  %v321_v28 = vsel %vm319_vm6, %v621_v3, %v196_v24 }
  0xe0   : > { %352 = vmatpush.msra.mxu0 %v320_v27  ;;  %372 = vmatpush.msra.mxu1 %v321_v28 }
  0xe1   : > { %471 = vmatmul.msk.f32.vlgmr.msra.gmra.mxu0 %vm329_vm9, %v328_v26  ;;  %473 = vmatmul.msk.f32.vlgmr.msra.gmra.mxu1 %vm329_vm9, %v328_v26 }
 0x15e   : > { %v354_v29 = vpop.f32.mrf.mxu0  ;;  %v374_v30 = vpop.f32.mrf.mxu1 }
 0x15f   : > { %377 = vst [vmem:[%s165_s30] sm:$0xff] %v354_v29 }
 0x160   : > { %378 = vst [vmem:[%s165_s30 + $0x8] sm:$0xff] %v374_v30 }
 0x161 PF: > { %s12_s11 = sadd.s32 1, %s567_s11   ;;  %s679_s9 = smov %s563_s10 }
 0x162   : > { %p9_p5 = scmp.ge.s32.totalorder %s12_s11, 4   ;;  %s680_s10 = smov %s682_s12 }
 0x164   :  { %11 = sbr.rel (!%p9_p5) target bundleno = 2 (0x2), region = 71 }

</bundles_post_ra>
